<compile_context>
chip_gen: v6e
topology: v6e:2x2x1
jax: 0.10.0
libtpu: 0.0.40
codegen_flags: <defaults>
</compile_context>

<pallas_src>
import functools

import jax
import jax.numpy as jnp
from jax import lax
from jax.experimental import pallas as pl
from jax.experimental.pallas import tpu as pltpu


def _cdiv(a, b):
    return -(-a // b)


def _ceil_to(x, m):
    return _cdiv(x, m) * m


def _sublane_mult(dtype):
    # rows per sublane tile: 8 for 32-bit, 16 for 16-bit, 32 for 8-bit dtypes.
    return 8 * max(1, 4 // jnp.dtype(dtype).itemsize)


def _vmem_capacity_bytes():
    try:
        return int(pltpu.get_tpu_info().vmem_capacity_bytes)
    except Exception:
        return 64 * 1024 * 1024  # conservative fallback (v7x per-TensorCore VMEM)


# ------------------------------ kernels -------------------------------------


def _rbf_kernel(x_ref, y_ref, yn_ref, o_ref, *, gamma, mxu_dtype):
    """Single-pass tile: full feature dim resident.

    x_ref : (tm, D)  X row tile (native dtype)
    y_ref : (tn, D)  Y row tile
    yn_ref: (1, tn)  pre-scaled -gamma * ||Y_j||^2 (f32, hoisted in the wrapper)
    o_ref : (tm, tn) output tile
    """
    x = x_ref[...]
    y = y_ref[...]
    if mxu_dtype is not None:
        x = x.astype(mxu_dtype)
        y = y.astype(mxu_dtype)
    # Contract the last (feature) dim of both operands: no Y transpose needed.
    xy = lax.dot_general(x, y, dimension_numbers=(((1,), (1,)), ((), ())),
                         preferred_element_type=jnp.float32)          # (tm, tn)
    xf = x_ref[...].astype(jnp.float32)
    xn = jnp.sum(xf * xf, axis=-1, keepdims=True)                     # (tm, 1)
    # exp(-g(||x||^2+||y||^2-2<x,y>)) = exp(2g<x,y> - g||x||^2 - g||y||^2)
    o_ref[...] = jnp.exp((2.0 * gamma) * xy - gamma * xn
                         + yn_ref[...]).astype(o_ref.dtype)


def _rbf_kernel_dblock(x_ref, y_ref, yn_ref, o_ref, acc_ref, *, gamma, mxu_dtype):
    """D-blocked tile: accumulate 2g<x,y> - g||x||^2 over feature blocks,
    exp + add -g||y||^2 + store in the epilogue of the last k step."""
    k = pl.program_id(2)

    @pl.when(k == 0)
    def _():
        acc_ref[...] = jnp.zeros_like(acc_ref)

    x = x_ref[...]
    y = y_ref[...]
    if mxu_dtype is not None:
        x = x.astype(mxu_dtype)
        y = y.astype(mxu_dtype)
    xy = lax.dot_general(x, y, dimension_numbers=(((1,), (1,)), ((), ())),
                         preferred_element_type=jnp.float32)
    xf = x_ref[...].astype(jnp.float32)
    xn = jnp.sum(xf * xf, axis=-1, keepdims=True)
    acc_ref[...] = acc_ref[...] + (2.0 * gamma) * xy - gamma * xn

    @pl.when(k == pl.num_programs(2) - 1)
    def _():
        o_ref[...] = jnp.exp(acc_ref[...] + yn_ref[...]).astype(o_ref.dtype)


# --------------------------- tile selection ----------------------------------


def _select_tiles(N, M, D, in_bytes, out_bytes, row_mult, budget,
                  tm_req, tn_req, tk_req, d_block):
    """Pick (tm, tn, tk, use_d_blocking) so the double-buffered working set fits
    in `budget` bytes of VMEM and all block shapes are layout-legal."""
    tm_req = max(row_mult, _ceil_to(int(tm_req), row_mult))
    tn_req = max(128, _ceil_to(int(tn_req), 128))
    tk_req = max(128, _ceil_to(int(tk_req), 128))

    tm = N if N <= tm_req else tm_req          # full-dim blocks are always legal
    tn = M if M <= tn_req else tn_req
    dblock = bool(d_block) and D > tk_req
    tk = min(tk_req, _ceil_to(D, 128)) if dblock else D

    def footprint(tm_, tn_, tk_, db):
        return (2 * (tm_ + tn_) * tk_ * in_bytes      # double-buffered X / Y tiles
                + 2 * tm_ * tn_ * out_bytes           # double-buffered output tile
                + (tm_ * tn_ * 4 if db else 0))       # f32 accumulator scratch

    # Prefer D-blocking over shrinking the output tile when the operand tiles
    # blow the budget (keeps writeback lane-dense, cuts Y re-read traffic).
    if d_block is None and D > tk_req and footprint(tm, tn, tk, dblock) > budget:
        dblock, tk = True, min(tk_req, _ceil_to(D, 128))

    while footprint(tm, tn, tk, dblock) > budget:
        if tn > 256:
            tn = max(256, _ceil_to(tn // 2, 128))
        elif tm > 256:
            tm = max(256, _ceil_to(tm // 2, row_mult))
        elif dblock and tk > 128:
            tk = max(128, _ceil_to(tk // 2, 128))
        else:
            break  # smallest sensible config; vmem_limit_bytes absorbs the rest

    # v7x has 2 TensorCores sharing the grid: make sure at least one "parallel"
    # axis has >= 2 blocks when the problem allows it (harmless on 1-TC chips).
    if _cdiv(N, tm) == 1 and _cdiv(M, tn) == 1:
        if M > 128:
            tn = max(128, _ceil_to(_cdiv(M, 2), 128))
        elif N > row_mult:
            tm = max(row_mult, _ceil_to(_cdiv(N, 2), row_mult))
    return tm, tn, tk, dblock


# ------------------------------- wrapper -------------------------------------


def rbf_pallas(X, Y, n, sigma=None, *, tm=512, tn=1024, tk=512,
               out_dtype=None, mxu_dtype=None, d_block=None):
    """Pallas TPU implementation of RBF(n, sigma).forward(X, Y).

    out_dtype : optional narrower output dtype (e.g. bf16) to halve writeback.
    mxu_dtype : optional operand dtype for the matmul (e.g. bf16 for large D).
    d_block   : None = auto (VMEM-driven), True/False = force / disable the
                D-blocked accumulator path.
    """
    N, D = X.shape
    M, D2 = Y.shape
    assert D == D2, "feature dimensions of X and Y must match"

    if sigma is None:
        sigma = 10 ** int(1 - n)
    gamma = 1.0 / (1e-8 + 2.0 * float(sigma) ** 2)

    out_dtype = jnp.dtype(X.dtype) if out_dtype is None else jnp.dtype(out_dtype)
    in_bytes = jnp.dtype(X.dtype).itemsize
    out_bytes = out_dtype.itemsize
    row_mult = max(_sublane_mult(X.dtype), _sublane_mult(out_dtype))

    vmem_cap = _vmem_capacity_bytes()
    budget = int(0.70 * vmem_cap)          # leave headroom for compiler scratch

    tm_e, tn_e, tk_e, dblock = _select_tiles(
        N, M, D, in_bytes, out_bytes, row_mult, budget, tm, tn, tk, d_block)

    # Hoist -gamma * ||Y_j||^2 out of the grid loop (one tiny pass over Y).
    yf = Y.astype(jnp.float32)
    ynorm = (-gamma) * jnp.sum(yf * yf, axis=-1).reshape(1, M)

    # Only the feature dim is ever padded (zeros are exact for dot and norms);
    # ragged N/M edges are handled by masked partial-block stores.
    Xk, Yk, Dp = X, Y, D
    if dblock:
        Dp = _ceil_to(D, tk_e)
        if Dp != D:
            Xk = jnp.pad(X, ((0, 0), (0, Dp - D)))
            Yk = jnp.pad(Y, ((0, 0), (0, Dp - D)))

    ni = _cdiv(N, tm_e)
    nj = _cdiv(M, tn_e)

    footprint = (2 * (tm_e + tn_e) * tk_e * in_bytes
                 + 2 * tm_e * tn_e * out_bytes
                 + (tm_e * tn_e * 4 if dblock else 0))
    vmem_limit = int(min(0.9 * vmem_cap, max(32 << 20, footprint + (8 << 20))))

    if dblock:
        nk = Dp // tk_e
        kernel = functools.partial(_rbf_kernel_dblock, gamma=gamma,
                                   mxu_dtype=mxu_dtype)
        grid = (ni, nj, nk)
        in_specs = [
            pl.BlockSpec((tm_e, tk_e), lambda i, j, k: (i, k)),   # X feature blk
            pl.BlockSpec((tn_e, tk_e), lambda i, j, k: (j, k)),   # Y feature blk
            pl.BlockSpec((1, tn_e), lambda i, j, k: (0, j)),      # -g*||Y||^2
        ]
        out_spec = pl.BlockSpec((tm_e, tn_e), lambda i, j, k: (i, j))
        scratch = [pltpu.VMEM((tm_e, tn_e), jnp.float32)]
        semantics = ("parallel", "parallel", "arbitrary")
    else:
        kernel = functools.partial(_rbf_kernel, gamma=gamma, mxu_dtype=mxu_dtype)
        grid = (ni, nj)
        in_specs = [
            pl.BlockSpec((tm_e, Dp), lambda i, j: (i, 0)),        # X row tile
            pl.BlockSpec((tn_e, Dp), lambda i, j: (j, 0)),        # Y row tile
            pl.BlockSpec((1, tn_e), lambda i, j: (0, j)),         # -g*||Y||^2
        ]
        out_spec = pl.BlockSpec((tm_e, tn_e), lambda i, j: (i, j))
        scratch = []
        semantics = ("parallel", "parallel")

    return pl.pallas_call(
        kernel,
        out_shape=jax.ShapeDtypeStruct((N, M), out_dtype),
        grid_spec=pltpu.PrefetchScalarGridSpec(
            num_scalar_prefetch=0,
            grid=grid,
            in_specs=in_specs,
            out_specs=out_spec,
            scratch_shapes=scratch,
        ),
        compiler_params=pltpu.CompilerParams(
            dimension_semantics=semantics,
            vmem_limit_bytes=vmem_limit),
    )(Xk, Yk, ynorm)


# ------------------------------ reference ------------------------------------


def rbf_ref(X, Y, n, sigma=None):
    """Pure-JAX reference mirroring the PyTorch forward exactly."""
    hi = lax.Precision.HIGHEST
    XX = jnp.matmul(X, X.T, precision=hi)
    XY = jnp.matmul(X, Y.T, precision=hi)
    YY = jnp.matmul(Y, Y.T, precision=hi)
    dnorm2 = -2.0 * XY + jnp.diag(XX)[:, None] + jnp.diag(YY)[None, :]
    if sigma is None:
        sigma = 10 ** int(1 - n)
    gamma = 1.0 / (1e-8 + 2.0 * float(sigma) ** 2)
    return jnp.exp(-gamma * dnorm2)


if __name__ == "__main__":
    # --- Test 1: small single-tile problem, default sigma from n ---
    key = jax.random.PRNGKey(0)
    kx, ky = jax.random.split(key)
    N, M, D = 16, 16, 8
    X = jax.random.normal(kx, (N, D), dtype=jnp.float32)
    Y = jax.random.normal(ky, (M, D), dtype=jnp.float32)
    out = jax.block_until_ready(rbf_pallas(X, Y, n=1, sigma=None))
    ref = rbf_ref(X, Y, n=1, sigma=None)
    assert out.shape == (N, M)
    assert jnp.allclose(out, ref, atol=5e-3, rtol=5e-2), "mismatch (small)"

    # --- Test 2: multi-tile + ragged (masked) edge blocks, f32 output ---
    kx2, ky2 = jax.random.split(jax.random.PRNGKey(1))
    N2, M2, D2 = 192, 384, 64
    X2 = jax.random.normal(kx2, (N2, D2), dtype=jnp.float32)
    Y2 = jax.random.normal(ky2, (M2, D2), dtype=jnp.float32)
    out2 = jax.block_until_ready(rbf_pallas(X2, Y2, n=1, sigma=6.0))
    ref2 = rbf_ref(X2, Y2, n=1, sigma=6.0)
    assert out2.shape == (N2, M2)
    assert jnp.allclose(out2, ref2, atol=2e-3, rtol=2e-2), "mismatch (tiled)"

    # --- Test 3: D-blocked accumulator path (forced), ragged M and ragged D ---
    kx3, ky3 = jax.random.split(jax.random.PRNGKey(2))
    N3, M3, D3 = 48, 200, 200
    X3 = jax.random.normal(kx3, (N3, D3), dtype=jnp.float32)
    Y3 = jax.random.normal(ky3, (M3, D3), dtype=jnp.float32)
    out3 = jax.block_until_ready(
        rbf_pallas(X3, Y3, n=1, sigma=10.0, tk=128, d_block=True))
    ref3 = rbf_ref(X3, Y3, n=1, sigma=10.0)
    assert out3.shape == (N3, M3)
    assert jnp.allclose(out3, ref3, atol=2e-3, rtol=2e-2), "mismatch (d-blocked)"

    # --- Test 4: bf16 output (halves the dominant N*M writeback traffic) ---
    out4 = jax.block_until_ready(
        rbf_pallas(X2, Y2, n=1, sigma=6.0, out_dtype=jnp.bfloat16))
    assert out4.dtype == jnp.bfloat16
    assert jnp.allclose(out4.astype(jnp.float32), ref2, atol=1e-2, rtol=5e-2), \
        "mismatch (bf16 out)"

    print("KERNEL_OK")
</pallas_src>

<mosaic_0001>
module attributes {stable_mosaic.version = 11 : i64} {
  func.func @_rbf_kernel(%arg0: i32, %arg1: i32, %arg2: memref<8x8xf32, #tpu.memory_space<vmem>>, %arg3: memref<16x8xf32, #tpu.memory_space<vmem>>, %arg4: memref<1x16xf32, #tpu.memory_space<vmem>>, %arg5: memref<8x16xf32, #tpu.memory_space<vmem>>) attributes {dimension_semantics = [#tpu.dimension_semantics<parallel>, #tpu.dimension_semantics<parallel>], iteration_bounds = array<i64: 2, 1>, scalar_prefetch = 0 : i64, scratch_operands = 0 : i64, tpu.core_type = #tpu.core_type<tc>, window_params = [{transform_indices = @transform_0, window_bounds = array<i64: 8, 8>}, {transform_indices = @transform_1, window_bounds = array<i64: 16, 8>}, {transform_indices = @transform_2, window_bounds = array<i64: 1, 16>}, {transform_indices = @transform_3, window_bounds = array<i64: 8, 16>}]} {
    %c0 = arith.constant 0 : index
    %c0_0 = arith.constant 0 : index
    %0 = vector.load %arg2[%c0, %c0_0] : memref<8x8xf32, #tpu.memory_space<vmem>>, vector<8x8xf32>
    %c0_1 = arith.constant 0 : index
    %c0_2 = arith.constant 0 : index
    %1 = vector.load %arg3[%c0_1, %c0_2] : memref<16x8xf32, #tpu.memory_space<vmem>>, vector<16x8xf32>
    %cst = arith.constant dense<0.000000e+00> : vector<8x16xf32>
    %2 = tpu.matmul %0, %1, %cst {dimension_numbers = #tpu.dot_dimension_numbers<[1], [1], [0], [0], [0, 0, 1, 0], [], []>} : vector<8x8xf32>, vector<16x8xf32>, vector<8x16xf32> -> vector<8x16xf32>
    %c0_3 = arith.constant 0 : index
    %c0_4 = arith.constant 0 : index
    %3 = vector.load %arg2[%c0_3, %c0_4] : memref<8x8xf32, #tpu.memory_space<vmem>>, vector<8x8xf32>
    %4 = arith.mulf %3, %3 : vector<8x8xf32>
    %cst_5 = arith.constant dense<0.000000e+00> : vector<8xf32>
    %5 = vector.multi_reduction <add>, %4, %cst_5 [1] : vector<8x8xf32> to vector<8xf32>
    %6 = vector.shape_cast %5 : vector<8xf32> to vector<8x1xf32>
    %cst_6 = arith.constant 1.000000e+00 : f32
    %7 = vector.broadcast %cst_6 : f32 to vector<8x16xf32>
    %8 = arith.mulf %7, %2 : vector<8x16xf32>
    %cst_7 = arith.constant 5.000000e-01 : f32
    %9 = vector.broadcast %cst_7 : f32 to vector<8x1xf32>
    %10 = arith.mulf %9, %6 : vector<8x1xf32>
    %11 = vector.broadcast %10 : vector<8x1xf32> to vector<8x16xf32>
    %12 = arith.subf %8, %11 : vector<8x16xf32>
    %c0_8 = arith.constant 0 : index
    %c0_9 = arith.constant 0 : index
    %13 = vector.load %arg4[%c0_8, %c0_9] : memref<1x16xf32, #tpu.memory_space<vmem>>, vector<1x16xf32>
    %14 = vector.broadcast %13 : vector<1x16xf32> to vector<8x16xf32>
    %15 = arith.addf %12, %14 : vector<8x16xf32>
    %16 = math.exp %15 : vector<8x16xf32>
    %c0_10 = arith.constant 0 : index
    %c0_11 = arith.constant 0 : index
    %17 = vector.load %arg5[%c0_10, %c0_11] : memref<8x16xf32, #tpu.memory_space<vmem>>, vector<8x16xf32>
    tpu.vector_store %arg5[%c0_10, %c0_11], %16 {strides = array<i32>} : memref<8x16xf32, #tpu.memory_space<vmem>>, vector<8x16xf32>,
    return
  }
  func.func @transform_0(%arg0: i32, %arg1: i32) -> (i32, i32) {
    %c0_i32 = arith.constant 0 : i32
    %c0_i32_0 = arith.constant 0 : i32
    return %arg0, %c0_i32 : i32, i32
  }
  func.func @transform_1(%arg0: i32, %arg1: i32) -> (i32, i32) {
    %c0_i32 = arith.constant 0 : i32
    %c0_i32_0 = arith.constant 0 : i32
    return %arg1, %c0_i32 : i32, i32
  }
  func.func @transform_2(%arg0: i32, %arg1: i32) -> (i32, i32) {
    %c0_i32 = arith.constant 0 : i32
    %c0_i32_0 = arith.constant 0 : i32
    return %c0_i32, %arg1 : i32, i32
  }
  func.func @transform_3(%arg0: i32, %arg1: i32) -> (i32, i32) {
    %c0_i32 = arith.constant 0 : i32
    return %arg0, %arg1 : i32, i32
  }
}

</mosaic_0001>

<bundles_post_ra>
// kernel: tpu_custom_call.1
= control target key start
LH: loop header
LB: loop body
LE: loop exit
PB: predicated region body
PF: predicated region fallthrough
CT: control target
= control target key end

     0   :  { %8 = vsyncpa [#allocation3], 0  ;;  %s732_s0 = inlined_call_operand.vmem [shape: f32[16,8], index: 0, kind: input, shape index: {}]   ;;  %s733_s1 = inlined_call_operand.vmem [shape: f32[16,8], index: 1, kind: input, shape index: {}]   ;;  %s734_s2 = inlined_call_operand.vmem [shape: f32[1,16], index: 2, kind: input, shape index: {}]   ;;  %s735_s3 = inlined_call_operand.hbm [shape: f32[16,16], index: 3, kind: output, shape index: {}]  }
   0x1   :  { %10 = vsyncpa [#allocation3 + $0x1], 0  ;;  %s614_s12 = smov 0   ;;  %s616_s13 = smov 0  }
   0x2   :  { %s618_s14 = smov 0   ;;  %s620_s15 = smov 0  }
   0x3   :  { %s622_s16 = smov 0   ;;  %s624_s17 = smov 0  }
   0x4 LB: > { %s427_s18 = sadd.s32 4294967295, %s589_s17   ;;  %s428_s19 = sadd.s32 4294967294, %s589_s17   ;;  %s589_s17 = sphi %s624_s17, %s16_s17   ;;  %s585_s16 = sphi %s622_s16, %s742_s16   ;;  %s581_s15 = sphi %s620_s15, %s741_s15   ;;  %s577_s14 = sphi %s618_s14, %s740_s14   ;;  %s573_s13 = sphi %s616_s13, %s739_s13   ;;  %s569_s12 = sphi %s614_s12, %s738_s12  }
   0x5   : > { %s28_s20 = sadd.s32 1, %s585_s16  ;;  %s115_s21 = sadd.s32 1, %s577_s14 }
   0x6   : > { %p30_p0 = scmp.ge.s32.totalorder %s28_s20, 2  ;;  %p125_p1 = scmp.ne.s32.totalorder %s577_s14, %s573_s13 }
   0x7   : > { %p126_p2 = scmp.eq.s32.totalorder %s427_s18, 1  ;;  %p131_p3 = scmp.ne.s32.totalorder %s573_s13, %s569_s12 }
   0x8   : > { %s744_s20 = smov (%p30_p0, %s28_s20), 0  ;;  %p132_p5 = scmp.eq.s32.totalorder %s428_s19, 1 }
   0x9   : > { %p654_p4 = por %p126_p2, %p125_p1  ;;  %s110_s23 = ssub.s32 %s585_s16, %s744_s20 }
   0xa   : > { %p433_p6 = scmp.ge.s32.totalorder %s589_s17, 1  ;;  %p113_p7 = scmp.eq.s32.totalorder %s110_s23, 0 }
   0xb   : > { %p661_p8 = por %p132_p5, %p131_p3  ;;  %p172_p9 = scmp.lt.s32.totalorder %s589_s17, 3 }
   0xc   : > { %s667_s25 = scalar_select %p113_p7, %s577_s14, %s115_s21  }
   0xd   : > { %p173_p10 = pnand %p433_p6, %p172_p9 }
   0xe   : > { %p203_p11 = scmp.lt.s32.totalorder (!%p173_p10), %s581_s15, 1  ;;  %s200_s10 = sand.u32 (!%p173_p10), 1, %s573_s13  }
   0xf   : > { %176 = sbr.rel (%p173_p10) target bundleno = 255 (0xff), region = 32  ;;  %s434_s11 = sshll.u32 (!%p173_p10), %s200_s10, 3 }
  0x10   : > { %s441_s18 = sshll.u32 (!%p173_p10), %s581_s15, 7  ;;  %s202_s19 = scalar_lea.vmem (!%p173_p10), [#allocation2], %s434_s11 }
  0x11   : > { %s332_s21 = sshll.u32 (!%p173_p10), %s202_s19, 4  ;;  %s692_s27 = scalar_lea.hbm (!%p173_p10), %s735_s3, %s441_s18  ;;  %s333_s21 = int_to_ptr.vmem [resolvable:$true] %s332_s21 }
  0x12   : > { %s513_s29 = scalar_lea.vmem (!%p173_p10), %s333_s21, 128  ;;  %s593_s30 = smov (!%p173_p10), [#allocation2]  }
  0x13   : > { %p514_p12 = scmp.ne.s32.totalorder (!%p173_p10), %s333_s21, %s513_s29 }
  0x14   : > { %v218_v0 = vld [vmem:[%s733_s1 + $0x8] sm:$0xff]  ;;  %vm219_vm0 = vcmask 64512   ;;  %v591_v1 = vmov 0.0   ;;  %vm592_vm1 = vmmov 0   ;;  %s204_s28 = scalar_select %p203_p11, %s581_s15, 1  ;;  %v217_v2 = vld [vmem:[%s733_s1] sm:$0xff] }
  0x15   : > { %447 = vmatprep.subr.mxu0 %v591_v1  ;;  %451 = vmatprep.mubr.msk.f32.mxu0 %vm592_vm1, %v591_v1  ;;  %v439_v9 = vld [vmem:[%s734_s2] ss:$0 sm:$0xff]  ;;  %vm315_vm2 = vcmask 130048   ;;  %p515_p13 = pnand %p514_p12, %p654_p4 }
  0x16   : > { %448 = vmatpush3.xpose.msk.msra.mxu0 %vm219_vm0, %v218_v0  ;;  %s435_s4 = sshll.u32 %s204_s28, 3  ;;  %s318_s28 = scalar_lea.sflag [#allocation3], %s200_s10 }
  0x17   : > { %449 = vmatprep.subr.mxu0 %v591_v1  ;;  %s206_s7 = scalar_lea.vmem %s732_s0, %s435_s4  ;;  %p516_p0 = pneg %p515_p13 }
  0x18   : > { %v216_v3 = vld [vmem:[%s206_s7] sm:$0xff]  ;;  %s517_s4 = sshll.u32 %s593_s30, 4  ;;  %s518_s4 = int_to_ptr.vmem [resolvable:$false] %s517_s4 }
  0x19   : > { %v299_v4 = vmul.f32 %v216_v3, %v216_v3  ;;  %s519_s15 = scalar_lea.vmem %s518_s4, 256  ;;  %p520_p1 = scmp.lt.s32.totalorder %s333_s21, %s518_s4 }
  0x1a   : > { %450 = vmatpush3.xpose.msk.msra.mxu0 %vm219_vm0, %v217_v2  ;;  %p521_p2 = scmp.lt.s32.totalorder %s519_s15, %s513_s29 }
  0x1b   : > { %v300_v5 = vsel %vm219_vm0, %v299_v4, 0.0 }
  0x1c   : > { %301 = vadd.xlane.f32.xlu0 %v300_v5  ;;  %p522_p3 = por %p521_p2, %p520_p1 }
  0x1d   : > { %452 = vmatmul.mubr.msk.f32.vlgmr.msra.gmra.mxu0 %vm219_vm0, %v216_v3 }
  0x1e   : > { %p523_p5 = pnand %p522_p3, %p516_p0 }
  0xa5   : > { %v302_v6 = vpop.xlane.xlu0 %301 }
  0xa6   : > { %v303_v7 = vmul.f32 0.5, %v302_v6 }
  0xdd   : > { %v295_v8 = vpop.f32.mrf.mxu0 }
  0xde   : > { %v304_v10 = vsub.f32 %v295_v8, %v303_v7 }
  0xdf   : > { %v453_v11 = vpop.f32.mrf.mxu0 }
  0xe0   : > { %v312_v12 = vadd.f32 %v439_v9, %v304_v10 }
  0xe2   : > { %v313_v13 = vmul.f32 1.442695, %v312_v12 }
  0xe4   : > { %511 = vpow2.f32 %v313_v13 }
  0xf1   : > { %v512_v14 = vpop.eup %511 }
  0xf2   : > { %316 = vst.msk [vmem:[%s202_s19] sm:$0xff] %vm315_vm2, %v512_v14 }
  0xf3   : > { %526 = shalt.err (!%p523_p5)
}
  0xf4   : > { %s527_s5 = scalar_lea.hbm %s692_s27, 128  ;;  %s531_s8 = scalar_lea.hbm %s735_s3, 256 }
  0xf5   : > { %p528_p6 = scmp.ne.s32.totalorder %s692_s27, %s527_s5  ;;  %p532_p10 = scmp.lt.s32.totalorder %s692_s27, %s735_s3 }
  0xf6   : > { %p533_p11 = scmp.lt.s32.totalorder %s531_s8, %s527_s5 }
  0xf7   : > { %p529_p7 = pnand %p528_p6, %p654_p4 }
  0xf8   : > { %p534_p12 = por %p533_p11, %p532_p10 }
  0xf9   : > { %p530_p9 = pneg %p529_p7 }
  0xfb   : > { %p535_p13 = pnand %p534_p12, %p530_p9 }
  0xfd   : > { %538 = shalt.err (!%p535_p13)
}
  0xfe   : > { %454 = dma.vmem_to_hbm [thread:$0]  (%p654_p4), %s333_s21, 128, %s692_s27, %s318_s28  }
  0xff PF: > { %p460_p0 = scmp.ge.s32.totalorder %s589_s17, 2  ;;  %s344_s11 = sand.u32 1, %s569_s12  }
 0x100   : > { %s345_s18 = scalar_lea.sflag [#allocation3], %s344_s11 }
 0x101   : > { %p457_p1 = pnand %p460_p0, %p661_p8 }
 0x103   : > { %p458_p2 = pneg %p457_p1 }
 0x105   : > { %564 = dma.done.wait (%p458_p2), %s345_s18, 128  }
 0x106   : > { %566 = vsyncadd (%p458_p2), %s345_s18, 4294967168  ;;  %s16_s17 = sadd.s32 1, %s589_s17   ;;  %s738_s12 = smov %s573_s13 }
 0x107   : > { %p13_p3 = scmp.ge.s32.totalorder %s16_s17, 4   ;;  %s739_s13 = smov %s577_s14 }
 0x108   : > { %s740_s14 = smov %s667_s25  ;;  %s741_s15 = smov %s585_s16 }
 0x109   : > { %s742_s16 = smov %s744_s20  ;;  %15 = sbr.rel (!%p13_p3) target bundleno = 4 (0x4), region = 73 }
 0x10e   :  { %350 = vsyncpa [#allocation3], 1 }
 0x10f   :  { %352 = vsyncpa [#allocation3 + $0x1], 1 }

</bundles_post_ra>
